<compile_context>
chip_gen: v7x
topology: tpu7x:2x2x1
jax: 0.10.0
libtpu: 0.0.40
codegen_flags: <defaults>
</compile_context>

<pallas_src>
import jax
import jax.numpy as jnp
from jax import lax
from jax.experimental import pallas as pl
from jax.experimental.pallas import tpu as pltpu


def _round_up(x, m):
    return ((x + m - 1) // m) * m


def _choose_tn(n, bytes_per_lane, max_tn, vmem_budget_bytes=8 * 1024 * 1024):
    """Pick a lane-tile size: multiple of 128, double-buffered step fits the budget."""
    cap = max(128, vmem_budget_bytes // (2 * max(1, bytes_per_lane)))
    tn = min(max_tn, cap, _round_up(n, 128))
    return max(128, (tn // 128) * 128)


# -----------------------------------------------------------------------------
# Kernel 1: fused conv_x (im2col matmul) + add g + relu + 1x1 sig_conv + sigmoid
#   cols_t : (Cin*27, N1)  im2col patches, spatial lane-dense
#   w1     : (Cg, Cin*27)  conv_x weight (resident)
#   g_t    : (Cg, N1)      upsampled gating signal
#   wsig   : (Cg, 1)       sig_conv weight (resident)
#   bsig   : (1, 1)        sig_conv bias (SMEM scalar)
#   out    : (1, N1)       sigmoid attention coefficients (lane-dense)
# -----------------------------------------------------------------------------
def _attn_coeff_kernel(cols_ref, w1_ref, g_ref, wsig_ref, bsig_ref, out_ref):
    # conv_x tile: (Cg, tn) = (Cg, K) @ (K, tn)   -- MXU, wide lane-dense output.
    conv_x = jnp.dot(w1_ref[...], cols_ref[...], preferred_element_type=jnp.float32)
    f = jnp.maximum(conv_x + g_ref[...].astype(jnp.float32), 0.0)
    # 1x1 sig-conv == weighted sublane reduction over Cg (keeps MXU out of N=1 work).
    logit = (
        jnp.sum(wsig_ref[...].astype(jnp.float32) * f, axis=0, keepdims=True)
        + bsig_ref[0, 0]
    )
    out_ref[...] = jax.nn.sigmoid(logit)


def attn_coeff(cols_t, w1, g_t, wsig, bsig, *, max_tn=4096):
    k_dim, n1 = cols_t.shape
    cg = g_t.shape[0]
    bytes_per_lane = (k_dim + cg + 1) * cols_t.dtype.itemsize
    tn = _choose_tn(n1, bytes_per_lane, max_tn)
    n1_pad = _round_up(n1, tn)
    if n1_pad != n1:
        cols_t = jnp.pad(cols_t, ((0, 0), (0, n1_pad - n1)))
        g_t = jnp.pad(g_t, ((0, 0), (0, n1_pad - n1)))
    out = pl.pallas_call(
        _attn_coeff_kernel,
        out_shape=jax.ShapeDtypeStruct((1, n1_pad), jnp.float32),
        grid=(n1_pad // tn,),
        in_specs=[
            pl.BlockSpec((k_dim, tn), lambda i: (0, i)),
            pl.BlockSpec((cg, k_dim), lambda i: (0, 0)),   # resident weights
            pl.BlockSpec((cg, tn), lambda i: (0, i)),
            pl.BlockSpec((cg, 1), lambda i: (0, 0)),       # resident weights
            pl.BlockSpec(memory_space=pltpu.MemorySpace.SMEM),
        ],
        out_specs=pl.BlockSpec((1, tn), lambda i: (0, i)),
        compiler_params=pltpu.CompilerParams(dimension_semantics=("parallel",)),
    )(cols_t, w1, g_t, wsig, bsig)
    if n1_pad != n1:
        out = out[:, :n1]
    return out


# -----------------------------------------------------------------------------
# Kernel 2: fused  y = sig_up * x  +  1x1 conv W  +  BatchNorm (eval, folded)
#   x3  : (B, Cin, DHW)    input, channels on sublanes, spatial lane-dense
#   a3  : (B, 1, DHW)      upsampled attention coefficients
#   w   : (Cout, Cin)      W conv weight with BN scale folded
#   b   : (Cout, 1)        W conv bias with BN shift folded
#   out : (B, Cout, DHW)
# Grid: (batch, lane-tiles) both parallel.
# -----------------------------------------------------------------------------
def _gate_project_kernel(x_ref, a_ref, w_ref, b_ref, o_ref):
    y = a_ref[0].astype(jnp.float32) * x_ref[0].astype(jnp.float32)      # (Cin, tn)
    wy = lax.dot_general(
        w_ref[...], y, (((1,), (0,)), ((), ())),
        preferred_element_type=jnp.float32)                              # (Cout, tn)
    o_ref[0] = wy + b_ref[...]


def gate_project(x3, a3, w_eff, b_eff, *, max_tn=8192):
    b, cin, n = x3.shape
    cout = w_eff.shape[0]
    bytes_per_lane = (cin + cout + 1) * 4
    tn = _choose_tn(n, bytes_per_lane, max_tn)
    n_pad = _round_up(n, tn)
    if n_pad != n:
        x3 = jnp.pad(x3, ((0, 0), (0, 0), (0, n_pad - n)))
        a3 = jnp.pad(a3, ((0, 0), (0, 0), (0, n_pad - n)))
    out = pl.pallas_call(
        _gate_project_kernel,
        out_shape=jax.ShapeDtypeStruct((b, cout, n_pad), jnp.float32),
        grid=(b, n_pad // tn),
        in_specs=[
            pl.BlockSpec((1, cin, tn), lambda bi, i: (bi, 0, i)),
            pl.BlockSpec((1, 1, tn), lambda bi, i: (bi, 0, i)),
            pl.BlockSpec((cout, cin), lambda bi, i: (0, 0)),   # resident
            pl.BlockSpec((cout, 1), lambda bi, i: (0, 0)),     # resident
        ],
        out_specs=pl.BlockSpec((1, cout, tn), lambda bi, i: (bi, 0, i)),
        compiler_params=pltpu.CompilerParams(
            dimension_semantics=("parallel", "parallel")),
    )(x3, a3, w_eff, b_eff)
    if n_pad != n:
        out = out[:, :, :n]
    return out


# -----------------------------------------------------------------------------
# Glue: im2col (transposed: K on sublanes, spatial lane-dense) for the
# 3x3x3 / stride-2 / valid conv
# -----------------------------------------------------------------------------
def im2col_3d_t(x, do, ho, wo, k=3, s=2):
    b, cin = x.shape[:2]
    patches = []
    for kd in range(k):
        for kh in range(k):
            for kw in range(k):
                patches.append(
                    x[:, :, kd: kd + s * do: s, kh: kh + s * ho: s, kw: kw + s * wo: s]
                )
    cols = jnp.stack(patches, axis=2)                # (B, Cin, 27, Do, Ho, Wo)
    cols = jnp.transpose(cols, (1, 2, 0, 3, 4, 5))   # (Cin, 27, B, Do, Ho, Wo)
    return cols.reshape(cin * k * k * k, b * do * ho * wo)


# -----------------------------------------------------------------------------
# Full forward (wrapper)
# -----------------------------------------------------------------------------
def attention_block_forward(x, g, params, *, use_bf16_inputs=False):
    # use_bf16_inputs halves the dominant im2col DMA volume and doubles MXU rate
    # on v6e/v7x (keep False on accuracy-sensitive paths / v5e VPU).
    B, Cin, D, H, W = x.shape
    Cg = params["w_convx"].shape[0]
    Do = (D - 3) // 2 + 1
    Ho = (H - 3) // 2 + 1
    Wo = (W - 3) // 2 + 1
    N1 = B * Do * Ho * Wo

    # --- stage 1: attention coefficients at conv_x resolution ---------------
    cols_t = im2col_3d_t(x, Do, Ho, Wo)                         # (Cin*27, N1)
    w1 = params["w_convx"].reshape(Cg, Cin * 27)                # (Cg, Cin*27)

    g_up = jax.image.resize(g, (B, Cg, Do, Ho, Wo), method="trilinear")
    g_t = jnp.transpose(g_up, (1, 0, 2, 3, 4)).reshape(Cg, N1)  # (Cg, N1)

    wsig = params["w_sig"].reshape(Cg, 1)                       # (Cg, 1)
    bsig = params["b_sig"].reshape(1, 1).astype(jnp.float32)

    if use_bf16_inputs:
        cols_t = cols_t.astype(jnp.bfloat16)
        w1 = w1.astype(jnp.bfloat16)
        g_t = g_t.astype(jnp.bfloat16)

    sig_flat = attn_coeff(cols_t, w1, g_t, wsig, bsig)          # (1, N1) lane-dense
    sig = sig_flat.reshape(B, Do, Ho, Wo)[:, None]              # (B,1,Do,Ho,Wo)

    # --- stage 2: upsample, gate, 1x1 conv W + folded BatchNorm (eval) -------
    sig_up = jax.image.resize(sig, (B, 1, D, H, W), method="trilinear")

    dhw = D * H * W
    x3 = x.reshape(B, Cin, dhw)          # free reshapes: channels-first is native
    a3 = sig_up.reshape(B, 1, dhw)

    Wm = params["w_W"][:, :, 0, 0, 0]                           # (Cout, Cin)
    Cout = Wm.shape[0]
    assert Cout == Cin, "AttentionBlock.W has out_channels == in_channels"
    scale = params["bn_gamma"] / jnp.sqrt(params["bn_var"] + 1e-5)
    w_eff = Wm * scale[:, None]                                 # (Cout, Cin)
    b_eff = ((params["b_W"] - params["bn_mean"]) * scale
             + params["bn_beta"]).reshape(Cout, 1)

    if use_bf16_inputs:
        x3 = x3.astype(jnp.bfloat16)
        a3 = a3.astype(jnp.bfloat16)

    wy3 = gate_project(x3, a3, w_eff, b_eff)                    # (B, Cout, dhw)
    W_y = wy3.reshape(B, Cout, D, H, W)
    return W_y, sig_up


# -----------------------------------------------------------------------------
# Pure-JAX reference (for correctness check)
# -----------------------------------------------------------------------------
def reference_forward(x, g, params):
    B, Cin, D, H, W = x.shape
    Cg = params["w_convx"].shape[0]
    conv_x = lax.conv_general_dilated(
        x, params["w_convx"], window_strides=(2, 2, 2), padding="VALID",
        dimension_numbers=("NCDHW", "OIDHW", "NCDHW"))
    _, _, Do, Ho, Wo = conv_x.shape
    g_up = jax.image.resize(g, (B, Cg, Do, Ho, Wo), method="trilinear")
    f = jnp.maximum(conv_x + g_up, 0.0)
    logit = jnp.einsum("bcdhw,oc->bodhw", f, params["w_sig"][:, :, 0, 0, 0]) \
        + params["b_sig"].reshape(1, -1, 1, 1, 1)
    sig = jax.nn.sigmoid(logit)
    sig_up = jax.image.resize(sig, (B, 1, D, H, W), method="trilinear")
    y = sig_up * x
    conv_out = jnp.einsum("bcdhw,oc->bodhw", y, params["w_W"][:, :, 0, 0, 0]) \
        + params["b_W"].reshape(1, -1, 1, 1, 1)
    scale = params["bn_gamma"] / jnp.sqrt(params["bn_var"] + 1e-5)
    W_y = (conv_out - params["bn_mean"].reshape(1, -1, 1, 1, 1)) \
        * scale.reshape(1, -1, 1, 1, 1) + params["bn_beta"].reshape(1, -1, 1, 1, 1)
    return W_y, sig_up


if __name__ == "__main__":
    # Small shapes consistent with the module: dimension=3, in_channels=4,
    # gating_channels=8, sub_sample_factor=(2,2,2), x spatial 8^3, g spatial 2^3.
    B, Cin, Cg = 2, 4, 8
    D = H = W = 8
    key = jax.random.PRNGKey(0)
    k = iter(jax.random.split(key, 12))

    x = jax.random.normal(next(k), (B, Cin, D, H, W), jnp.float32)
    g = jax.random.normal(next(k), (B, Cg, 2, 2, 2), jnp.float32)

    params = {
        "w_convx": 0.1 * jax.random.normal(next(k), (Cg, Cin, 3, 3, 3), jnp.float32),
        "w_sig":   0.2 * jax.random.normal(next(k), (1, Cg, 1, 1, 1), jnp.float32),
        "b_sig":   0.1 * jax.random.normal(next(k), (1,), jnp.float32),
        "w_W":     0.3 * jax.random.normal(next(k), (Cin, Cin, 1, 1, 1), jnp.float32),
        "b_W":     0.1 * jax.random.normal(next(k), (Cin,), jnp.float32),
        "bn_gamma": 1.0 + 0.1 * jax.random.normal(next(k), (Cin,), jnp.float32),
        "bn_beta":  0.1 * jax.random.normal(next(k), (Cin,), jnp.float32),
        "bn_mean":  0.1 * jax.random.normal(next(k), (Cin,), jnp.float32),
        "bn_var":   0.5 + jnp.abs(jax.random.normal(next(k), (Cin,), jnp.float32)),
    }

    W_y, sig_up = jax.jit(attention_block_forward)(x, g, params)
    jax.block_until_ready((W_y, sig_up))

    W_y_ref, sig_up_ref = reference_forward(x, g, params)
    assert W_y.shape == (B, Cin, D, H, W) and sig_up.shape == (B, 1, D, H, W)
    assert jnp.allclose(W_y, W_y_ref, atol=1e-4, rtol=1e-4)
    assert jnp.allclose(sig_up, sig_up_ref, atol=1e-4, rtol=1e-4)

    print("KERNEL_OK")
</pallas_src>

<mosaic_0001>
module attributes {stable_mosaic.version = 11 : i64} {
  func.func @_attn_coeff_kernel(%arg0: i32, %arg1: memref<108x128xf32, #tpu.memory_space<vmem>>, %arg2: memref<8x108xf32, #tpu.memory_space<vmem>>, %arg3: memref<8x128xf32, #tpu.memory_space<vmem>>, %arg4: memref<8x1xf32, #tpu.memory_space<vmem>>, %arg5: memref<1x1xf32, #tpu.memory_space<smem>>, %arg6: memref<1x128xf32, #tpu.memory_space<vmem>>) attributes {dimension_semantics = [#tpu.dimension_semantics<parallel>], iteration_bounds = array<i64: 1>, scalar_prefetch = 0 : i64, scratch_operands = 0 : i64, tpu.core_type = #tpu.core_type<tc>, window_params = [{transform_indices = @transform_0, window_bounds = array<i64: 108, 128>}, {pipeline_mode = #tpu.pipeline_mode<synchronous>, transform_indices = @transform_1, window_bounds = array<i64: 8, 108>}, {transform_indices = @transform_2, window_bounds = array<i64: 8, 128>}, {pipeline_mode = #tpu.pipeline_mode<synchronous>, transform_indices = @transform_3, window_bounds = array<i64: 8, 1>}, {transform_indices = @transform_4, window_bounds = array<i64: 1, 1>}, {transform_indices = @transform_5, window_bounds = array<i64: 1, 128>}]} {
    %c0 = arith.constant 0 : index
    %c0_0 = arith.constant 0 : index
    %0 = vector.load %arg2[%c0, %c0_0] : memref<8x108xf32, #tpu.memory_space<vmem>>, vector<8x108xf32>
    %c0_1 = arith.constant 0 : index
    %c0_2 = arith.constant 0 : index
    %1 = vector.load %arg1[%c0_1, %c0_2] : memref<108x128xf32, #tpu.memory_space<vmem>>, vector<108x128xf32>
    %cst = arith.constant dense<0.000000e+00> : vector<8x128xf32>
    %2 = tpu.matmul %0, %1, %cst {dimension_numbers = #tpu.dot_dimension_numbers<[1], [0], [0], [1], [0, 0, 1, 1], [], []>} : vector<8x108xf32>, vector<108x128xf32>, vector<8x128xf32> -> vector<8x128xf32>
    %c0_3 = arith.constant 0 : index
    %c0_4 = arith.constant 0 : index
    %3 = vector.load %arg3[%c0_3, %c0_4] : memref<8x128xf32, #tpu.memory_space<vmem>>, vector<8x128xf32>
    %4 = arith.addf %2, %3 : vector<8x128xf32>
    %cst_5 = arith.constant 0.000000e+00 : f32
    %5 = vector.broadcast %cst_5 : f32 to vector<8x128xf32>
    %6 = arith.maximumf %4, %5 : vector<8x128xf32>
    %c0_6 = arith.constant 0 : index
    %c0_7 = arith.constant 0 : index
    %7 = vector.load %arg4[%c0_6, %c0_7] : memref<8x1xf32, #tpu.memory_space<vmem>>, vector<8x1xf32>
    %8 = vector.broadcast %7 : vector<8x1xf32> to vector<8x128xf32>
    %9 = arith.mulf %8, %6 : vector<8x128xf32>
    %cst_8 = arith.constant dense<0.000000e+00> : vector<128xf32>
    %10 = vector.multi_reduction <add>, %9, %cst_8 [0] : vector<8x128xf32> to vector<128xf32>
    %11 = vector.shape_cast %10 : vector<128xf32> to vector<1x128xf32>
    %c0_9 = arith.constant 0 : index
    %c0_10 = arith.constant 0 : index
    %12 = memref.load %arg5[%c0_9, %c0_10] : memref<1x1xf32, #tpu.memory_space<smem>>
    %13 = vector.broadcast %12 : f32 to vector<1x128xf32>
    %14 = arith.addf %11, %13 : vector<1x128xf32>
    %15 = arith.negf %14 : vector<1x128xf32>
    %16 = math.exp %15 : vector<1x128xf32>
    %cst_11 = arith.constant 1.000000e+00 : f32
    %17 = vector.broadcast %cst_11 : f32 to vector<1x128xf32>
    %18 = arith.addf %17, %16 : vector<1x128xf32>
    %19 = arith.divf %17, %18 : vector<1x128xf32>
    %c0_12 = arith.constant 0 : index
    %c0_13 = arith.constant 0 : index
    %20 = vector.load %arg6[%c0_12, %c0_13] : memref<1x128xf32, #tpu.memory_space<vmem>>, vector<1x128xf32>
    tpu.vector_store %arg6[%c0_12, %c0_13], %19 {strides = array<i32>} : memref<1x128xf32, #tpu.memory_space<vmem>>, vector<1x128xf32>,
    return
  }
  func.func @transform_0(%arg0: i32) -> (i32, i32) {
    %c0_i32 = arith.constant 0 : i32
    %c0_i32_0 = arith.constant 0 : i32
    return %c0_i32, %arg0 : i32, i32
  }
  func.func @transform_1(%arg0: i32) -> (i32, i32) {
    %c0_i32 = arith.constant 0 : i32
    %c0_i32_0 = arith.constant 0 : i32
    %c0_i32_1 = arith.constant 0 : i32
    return %c0_i32, %c0_i32_0 : i32, i32
  }
  func.func @transform_2(%arg0: i32) -> (i32, i32) {
    %c0_i32 = arith.constant 0 : i32
    %c0_i32_0 = arith.constant 0 : i32
    return %c0_i32, %arg0 : i32, i32
  }
  func.func @transform_3(%arg0: i32) -> (i32, i32) {
    %c0_i32 = arith.constant 0 : i32
    %c0_i32_0 = arith.constant 0 : i32
    %c0_i32_1 = arith.constant 0 : i32
    return %c0_i32, %c0_i32_0 : i32, i32
  }
  func.func @transform_4(%arg0: i32) -> (i32, i32) {
    %c0_i32 = arith.constant 0 : i32
    %c0_i32_0 = arith.constant 0 : i32
    %c0_i32_1 = arith.constant 0 : i32
    return %c0_i32, %c0_i32_0 : i32, i32
  }
  func.func @transform_5(%arg0: i32) -> (i32, i32) {
    %c0_i32 = arith.constant 0 : i32
    %c0_i32_0 = arith.constant 0 : i32
    return %c0_i32, %arg0 : i32, i32
  }
}

module attributes {stable_mosaic.version = 11 : i64} {
  func.func @_gate_project_kernel(%arg0: i32, %arg1: i32, %arg2: memref<1x4x512xf32, #tpu.memory_space<vmem>>, %arg3: memref<1x1x512xf32, #tpu.memory_space<vmem>>, %arg4: memref<4x4xf32, #tpu.memory_space<vmem>>, %arg5: memref<4x1xf32, #tpu.memory_space<vmem>>, %arg6: memref<1x4x512xf32, #tpu.memory_space<vmem>>) attributes {dimension_semantics = [#tpu.dimension_semantics<parallel>, #tpu.dimension_semantics<parallel>], iteration_bounds = array<i64: 2, 1>, scalar_prefetch = 0 : i64, scratch_operands = 0 : i64, tpu.core_type = #tpu.core_type<tc>, window_params = [{transform_indices = @transform_0, window_bounds = array<i64: 1, 4, 512>}, {transform_indices = @transform_1, window_bounds = array<i64: 1, 1, 512>}, {pipeline_mode = #tpu.pipeline_mode<synchronous>, transform_indices = @transform_2, window_bounds = array<i64: 4, 4>}, {pipeline_mode = #tpu.pipeline_mode<synchronous>, transform_indices = @transform_3, window_bounds = array<i64: 4, 1>}, {transform_indices = @transform_4, window_bounds = array<i64: 1, 4, 512>}]} {
    %c0 = arith.constant 0 : index
    %c0_0 = arith.constant 0 : index
    %c0_1 = arith.constant 0 : index
    %0 = vector.load %arg3[%c0, %c0_0, %c0_1] : memref<1x1x512xf32, #tpu.memory_space<vmem>>, vector<1x1x512xf32>
    %1 = vector.shape_cast %0 : vector<1x1x512xf32> to vector<1x512xf32>
    %c0_2 = arith.constant 0 : index
    %c0_3 = arith.constant 0 : index
    %c0_4 = arith.constant 0 : index
    %2 = vector.load %arg2[%c0_2, %c0_3, %c0_4] : memref<1x4x512xf32, #tpu.memory_space<vmem>>, vector<1x4x512xf32>
    %3 = vector.shape_cast %2 : vector<1x4x512xf32> to vector<4x512xf32>
    %4 = vector.broadcast %1 : vector<1x512xf32> to vector<4x512xf32>
    %5 = arith.mulf %4, %3 : vector<4x512xf32>
    %c0_5 = arith.constant 0 : index
    %c0_6 = arith.constant 0 : index
    %6 = vector.load %arg4[%c0_5, %c0_6] : memref<4x4xf32, #tpu.memory_space<vmem>>, vector<4x4xf32>
    %cst = arith.constant dense<0.000000e+00> : vector<4x512xf32>
    %7 = tpu.matmul %6, %5, %cst {dimension_numbers = #tpu.dot_dimension_numbers<[1], [0], [0], [1], [0, 0, 1, 1], [], []>} : vector<4x4xf32>, vector<4x512xf32>, vector<4x512xf32> -> vector<4x512xf32>
    %c0_7 = arith.constant 0 : index
    %c0_8 = arith.constant 0 : index
    %8 = vector.load %arg5[%c0_7, %c0_8] : memref<4x1xf32, #tpu.memory_space<vmem>>, vector<4x1xf32>
    %9 = vector.broadcast %8 : vector<4x1xf32> to vector<4x512xf32>
    %10 = arith.addf %7, %9 : vector<4x512xf32>
    %c0_9 = arith.constant 0 : index
    %c0_10 = arith.constant 0 : index
    %c0_11 = arith.constant 0 : index
    %11 = vector.load %arg6[%c0_9, %c0_10, %c0_11] : memref<1x4x512xf32, #tpu.memory_space<vmem>>, vector<1x4x512xf32>
    %12 = vector.shape_cast %11 : vector<1x4x512xf32> to vector<4x512xf32>
    %13 = vector.shape_cast %10 : vector<4x512xf32> to vector<1x4x512xf32>
    tpu.vector_store %arg6[%c0_9, %c0_10, %c0_11], %13 {strides = array<i32>} : memref<1x4x512xf32, #tpu.memory_space<vmem>>, vector<1x4x512xf32>,
    return
  }
  func.func @transform_0(%arg0: i32, %arg1: i32) -> (i32, i32, i32) {
    %c0_i32 = arith.constant 0 : i32
    %c0_i32_0 = arith.constant 0 : i32
    return %arg0, %c0_i32, %arg1 : i32, i32, i32
  }
  func.func @transform_1(%arg0: i32, %arg1: i32) -> (i32, i32, i32) {
    %c0_i32 = arith.constant 0 : i32
    %c0_i32_0 = arith.constant 0 : i32
    return %arg0, %c0_i32, %arg1 : i32, i32, i32
  }
  func.func @transform_2(%arg0: i32, %arg1: i32) -> (i32, i32) {
    %c0_i32 = arith.constant 0 : i32
    %c0_i32_0 = arith.constant 0 : i32
    %c0_i32_1 = arith.constant 0 : i32
    return %c0_i32, %c0_i32_0 : i32, i32
  }
  func.func @transform_3(%arg0: i32, %arg1: i32) -> (i32, i32) {
    %c0_i32 = arith.constant 0 : i32
    %c0_i32_0 = arith.constant 0 : i32
    %c0_i32_1 = arith.constant 0 : i32
    return %c0_i32, %c0_i32_0 : i32, i32
  }
  func.func @transform_4(%arg0: i32, %arg1: i32) -> (i32, i32, i32) {
    %c0_i32 = arith.constant 0 : i32
    %c0_i32_0 = arith.constant 0 : i32
    return %arg0, %c0_i32, %arg1 : i32, i32, i32
  }
}

</mosaic_0001>

<bundles_post_ra>
// kernel: attention_block_forward.2
= control target key start
LH: loop header
LB: loop body
LE: loop exit
PB: predicated region body
PF: predicated region fallthrough
CT: control target
= control target key end

     0   :  { %v224_v0 = vmov 0.0|0.0   ;;  %vm225_vm0 = vmmov 0   ;;  %v226_v6 = vmov 0.0   ;;  %v227_v7 = vmov 0   ;;  %s316_s0 = inlined_call_operand.vmem [shape: f32[108,128], index: 0, kind: input, shape index: {}]   ;;  %s317_s3 = inlined_call_operand.vmem [shape: f32[8,1], index: 3, kind: input, shape index: {}]   ;;  %s318_s1 = inlined_call_operand.vmem [shape: f32[8,108], index: 1, kind: input, shape index: {}]   ;;  %s319_s2 = inlined_call_operand.vmem [shape: f32[8,128], index: 2, kind: input, shape index: {}]   ;;  %s320_s4 = inlined_call_operand.<no memory space> [shape: f32[1,1], index: 4, kind: input, shape index: {}]   ;;  %s321_s5 = inlined_call_operand.vmem [shape: f32[1,128], index: 5, kind: output, shape index: {}]  }
   0x1   :  { %192 = vmatprep.subr.bf16.mxu0 %v224_v0  ;;  %v22_v1 = vld [vmem:[%s316_s0] sm:$0xff]  ;;  %v23_v2 = vld [vmem:[%s316_s0 + $0x8] sm:$0xff]  ;;  %v24_v3 = vld [vmem:[%s316_s0 + $0x10] sm:$0xff]  ;;  %189 = vmatprep.mubr.msk.f32.mxu0 %vm225_vm0, %v226_v6  ;;  %vm41_vm1 = vcmask 1043456   ;;  %vm228_vm2 = vmmov 1   ;;  %vm37_vm4 = vcmask 883712   ;;  %v130_v38 = vstv %s320_s4 }
   0x2   :  { %v193_v4 = vpack.c.bf16 %v23_v2, %v22_v1  ;;  %v25_v5 = vld [vmem:[%s316_s0 + $0x18] sm:$0xff]  ;;  %219 = vset.pattern.permute.xlu0 %v227_v7  ;;  %v26_v9 = vld [vmem:[%s316_s0 + $0x20] sm:$0xff]  ;;  %v27_v10 = vld [vmem:[%s316_s0 + $0x28] sm:$0xff] }
   0x3   :  { %v196_v8 = vpack.c.bf16 %v25_v5, %v24_v3  ;;  %v116_v11 = vld [vmem:[%s317_s3] sm:$0xff]  ;;  %v199_v12 = vpack.c.bf16 %v27_v10, %v26_v9  ;;  %v28_v13 = vld [vmem:[%s316_s0 + $0x30] sm:$0xff]  ;;  %v29_v14 = vld [vmem:[%s316_s0 + $0x38] sm:$0xff] }
   0x4   :  { %194 = vmatpush3.bf16.msra.mxu0 %v193_v4  ;;  %119 = vperm.xlu0 %219, %v116_v11   ;;  %v202_v15 = vpack.c.bf16 %v29_v14, %v28_v13  ;;  %v30_v16 = vld [vmem:[%s316_s0 + $0x40] sm:$0xff]  ;;  %v31_v17 = vld [vmem:[%s316_s0 + $0x48] sm:$0xff]  ;;  %v32_v19 = vld [vmem:[%s316_s0 + $0x50] sm:$0xff] }
   0x5   :  { %195 = vmatprep.subr.bf16.mxu0 %v224_v0  ;;  %v205_v18 = vpack.c.bf16 %v31_v17, %v30_v16  ;;  %v33_v20 = vld [vmem:[%s316_s0 + $0x58] sm:$0xff]  ;;  %v34_v22 = vld [vmem:[%s316_s0 + $0x60] sm:$0xff]  ;;  %v35_v23 = vld [vmem:[%s316_s0 + $0x68] sm:$0xf] }
   0x6   :  { %v208_v21 = vpack.c.bf16 %v33_v20, %v32_v19  ;;  %v211_v24 = vpack.c.bf16 %v35_v23, %v34_v22  ;;  %vm212_vm3 = vmpackc.low %vm41_vm1, %vm228_vm2  ;;  %v21_v25 = vld [vmem:[%s318_s1] sm:$0xff] }
   0x7   :  { %v36_v26 = vld [vmem:[%s319_s2] sm:$0xff] }
   0x8   :  { %197 = vmatpush3.bf16.msra.mxu0 %v196_v8 }
   0x9   :  { %198 = vmatprep.subr.bf16.mxu0 %v224_v0 }
   0xc   :  { %200 = vmatpush3.bf16.msra.mxu0 %v199_v12 }
   0xd   :  { %201 = vmatprep.subr.bf16.mxu0 %v224_v0 }
  0x10   :  { %203 = vmatpush3.bf16.msra.mxu0 %v202_v15 }
  0x11   :  { %204 = vmatprep.subr.bf16.mxu0 %v224_v0 }
  0x14   :  { %206 = vmatpush3.bf16.msra.mxu0 %v205_v18 }
  0x15   :  { %207 = vmatprep.subr.bf16.mxu0 %v224_v0 }
  0x18   :  { %209 = vmatpush3.bf16.msra.mxu0 %v208_v21 }
  0x19   :  { %210 = vmatprep.subr.bf16.mxu0 %v224_v0 }
  0x1c   :  { %213 = vmatpush3.bf16.msk.msra.mxu0 %vm212_vm3, %v211_v24 }
  0x1f   :  { %190 = vmatmul.mubr.msk.f32.vlgmr.msra.gmra.mrb[0].mxu0 %vm37_vm4, %v21_v25 }
  0x83   :  { %v120_v30 = vpop.permute.xlu0 %119 }
  0xf2   :  { %v111_v27 = vpop.f32.mrb[0].mxu0 }
  0xf3   :  { %v112_v28 = vadd.f32 %v111_v27, %v36_v26  ;;  %v191_v29 = vpop.f32.mrb[1].mxu0 }
  0xf5   :  { %v115_v31 = vmax.f32 %v112_v28, 0.0 }
  0xf7   :  { %v122_v32 = vmul.f32 %v120_v30, %v115_v31 }
  0xf9   :  { %v123_v33 = vrot.slane %v122_v32, 4 }
  0xfb   :  { %v124_v34 = vadd.f32 %v123_v33, %v122_v32 }
  0xfd   :  { %v125_v35 = vrot.slane %v124_v34, 2 }
  0xff   :  { %v126_v36 = vadd.f32 %v125_v35, %v124_v34 }
 0x101   :  { %v127_v37 = vrot.slane %v126_v36, 1 }
 0x103   :  { %v128_v39 = vadd.f32 %v127_v37, %v126_v36 }
 0x105   :  { %v131_v40 = vadd.f32 %v130_v38, %v128_v39 }
 0x107   :  { %v145_v41 = vmul.f32 -1.442695, %v131_v40 }
 0x109   :  { %220 = vpow2.f32 %v145_v41 }
 0x113   :  { %v221_v42 = vpop.eup %220 }
 0x114   :  { %v135_v43 = vadd.f32 1.0, %v221_v42 }
 0x116   :  { %222 = vrcp.f32 %v135_v43 }
 0x120   :  { %v223_v44 = vpop.eup %222 }
 0x121   :  { %138 = vst [vmem:[%s321_s5] sm:$0x1] %v223_v44 }

// kernel: attention_block_forward.3
= control target key start
LH: loop header
LB: loop body
LE: loop exit
PB: predicated region body
PF: predicated region fallthrough
CT: control target
= control target key end

     0   :  { %s682_s15 = smov 0   ;;  %s684_s16 = smov 0   ;;  %s732_s0 = inlined_call_operand.vmem [shape: f32[2,4,512], index: 0, kind: input, shape index: {}]   ;;  %s733_s1 = inlined_call_operand.vmem [shape: f32[2,1,512], index: 1, kind: input, shape index: {}]   ;;  %s734_s2 = inlined_call_operand.vmem [shape: f32[4,4], index: 2, kind: input, shape index: {}]   ;;  %s735_s3 = inlined_call_operand.vmem [shape: f32[4,1], index: 3, kind: input, shape index: {}]   ;;  %s736_s4 = inlined_call_operand.vmem [shape: f32[2,4,512], index: 4, kind: output, shape index: {}]  }
   0x1   :  { %s686_s17 = smov 0  }
   0x2 LB: > { %s26_s18 = sadd.s32 1, %s649_s16  ;;  %p586_p0 = scmp.ge.s32.totalorder %s653_s17, 1  ;;  %s653_s17 = sphi %s686_s17, %s14_s17   ;;  %s649_s16 = sphi %s684_s16, %s738_s16   ;;  %s645_s15 = sphi %s682_s15, %s737_s15  }
   0x3   : > { %p28_p1 = scmp.ge.s32.totalorder %s26_s18, 2  ;;  %p199_p2 = scmp.lt.s32.totalorder %s653_s17, 3 }
   0x5   : > { %s740_s18 = smov (%p28_p1, %s26_s18), 0  ;;  %p200_p3 = pnand %p586_p0, %p199_p2 }
   0x6   : > { %p242_p4 = scmp.lt.s32.totalorder (!%p200_p3), %s645_s15, 1  ;;  %v274_v0 = vlaneseq (!%p200_p3)  ;;  %v655_v1 = vmov (!%p200_p3), 0.0   ;;  %v305_v2 = vld [vmem:[%s735_s3] sm:$0xf] (!%p200_p3)  ;;  %v656_v4 = vmov (!%p200_p3), 0   ;;  %vm315_vm0 = vcmask (!%p200_p3), 1043456  }
   0x7   : > { %203 = sbr.rel (%p200_p3) target bundleno = 243 (0xf3), region = 36  ;;  %392 = vmatprep.mubr.f32.mxu0 (!%p200_p3), %v655_v1  ;;  %463 = vmatprep.mubr.f32.mxu1 (!%p200_p3), %v655_v1  ;;  %v304_v22 = vld [vmem:[%s734_s2] sm:$0xf] (!%p200_p3)  ;;  %vm311_vm1 = vcmask (!%p200_p3), 31744  }
   0x8   : > { %v275_v3 = vshrl.u32 (!%p200_p3), %v274_v0, 7  ;;  %628 = vset.pattern.permute.xlu0 (!%p200_p3), %v656_v4 }
   0x9   : > { %308 = vperm.xlu0 (!%p200_p3), %628, %v305_v2  }
   0xa   : > { %v280_v5 = vsub.s32 (!%p200_p3), 1, %v275_v3  ;;  %v288_v6 = vsub.s32 (!%p200_p3), 3, %v275_v3  ;;  %v276_v7 = vsub.s32 (!%p200_p3), 0, %v275_v3  ;;  %v284_v8 = vsub.s32 (!%p200_p3), 2, %v275_v3 }
   0xe   : > { %s742_s15 = smov (!%p242_p4, %s645_s15), 1 }
   0xf   : > { %s600_s21 = sshll.u32 %s742_s15, 4  ;;  %s589_s22 = sshll.u32 %s742_s15, 2 }
  0x10   : > { %s249_s25 = scalar_lea.vmem %s732_s0, %s600_s21  ;;  %s258_s28 = scalar_lea.vmem %s733_s1, %s589_s22 }
  0x11   : > { %v270_v9 = vld [vmem:[%s258_s28] sm:$0xf]  ;;  %v272_v11 = vld [vmem:[%s249_s25 + $0x8] sm:$0xff]  ;;  %s268_s7 = scalar_lea.vmem %s736_s4, %s600_s21 }
  0x12   : > { %v271_v10 = vld [vmem:[%s249_s25] sm:$0xff]  ;;  %v281_v12 = vrot.slane %v270_v9, %v280_v5  ;;  %v289_v14 = vrot.slane %v270_v9, %v288_v6  ;;  %v297_v15 = vcombine.high %v272_v11, %v272_v11  ;;  %v277_v16 = vrot.slane %v270_v9, %v276_v7 }
  0x13   : > { %v296_v13 = vcombine.high %v271_v10, %v271_v10  ;;  %v285_v17 = vrot.slane %v270_v9, %v284_v8 }
  0x14   : > { %v303_v19 = vmul.f32 %v297_v15, %v289_v14  ;;  %v300_v20 = vmul.f32 %v277_v16, %v271_v10 }
  0x15   : > { %v301_v18 = vmul.f32 %v296_v13, %v281_v12  ;;  %v302_v21 = vmul.f32 %v285_v17, %v272_v11 }
  0x16   : > { %595 = vmatprep.subr.msk.mxu1 %vm315_vm0, %v303_v19 }
  0x17   : > { %592 = vmatprep.subr.msk.mxu0 %vm315_vm0, %v301_v18  ;;  %596 = vmatpush1.msk.msra.mxu1 %vm315_vm0, %v302_v21 }
  0x18   : > { %593 = vmatpush1.msk.msra.mxu0 %vm315_vm0, %v300_v20  ;;  %597 = vmatmul.mubr.msk.f32.vlgmr.msra.gmra.mrb[0].mxu1 %vm311_vm1, %v304_v22 }
  0x19   : > { %594 = vmatmul.mubr.msk.f32.vlgmr.msra.gmra.mrb[0].mxu0 %vm311_vm1, %v304_v22 }
  0x88   : > { %v309_v23 = vpop.permute.xlu0 %308 }
  0xeb   : > { %v465_v25 = vpop.f32.mrb[0].mxu1 }
  0xec   : > { %v394_v24 = vpop.f32.mrb[0].mxu0  ;;  %v466_v27 = vadd.f32 %v465_v25, %v309_v23  ;;  %v467_v29 = vpop.f32.mrb[1].mxu1 }
  0xed   : > { %v395_v26 = vadd.f32 %v394_v24, %v309_v23  ;;  %v396_v28 = vpop.f32.mrb[1].mxu0  ;;  %v468_v31 = vadd.f32 %v467_v29, %v309_v23 }
  0xee   : > { %v397_v30 = vadd.f32 %v396_v28, %v309_v23 }
  0xef   : > { %v475_v33 = vcombine.low %v466_v27, %v468_v31 }
  0xf0   : > { %v474_v32 = vcombine.low %v395_v26, %v397_v30 }
  0xf1   : > { %479 = vst [vmem:[%s268_s7 + $0x8] sm:$0xff] %v475_v33 }
  0xf2   : > { %478 = vst [vmem:[%s268_s7] sm:$0xff] %v474_v32 }
  0xf3 PF: > { %s14_s17 = sadd.s32 1, %s653_s17   ;;  %s737_s15 = smov %s649_s16 }
  0xf4   : > { %p11_p5 = scmp.ge.s32.totalorder %s14_s17, 4   ;;  %s738_s16 = smov %s740_s18 }
  0xf6   :  { %13 = sbr.rel (!%p11_p5) target bundleno = 2 (0x2), region = 69 }

</bundles_post_ra>
